<compile_context>
chip_gen: v7x
topology: tpu7x:2x2x1
jax: 0.10.0
libtpu: 0.0.40
codegen_flags: <defaults>
</compile_context>

<pallas_src>
import math
import functools
import numpy as np

import jax
import jax.numpy as jnp
from jax.experimental import pallas as pl
from jax.experimental.pallas import tpu as pltpu

# ---- model hyper-parameters (consistent with the PyTorch module) ------------
N_EMBD = 32          # n_embd
N_HEAD = 4           # n_head
N_AGENT = 8          # n_agent -> sequence length L
HEAD_DIM = N_EMBD // N_HEAD
LN_EPS = 1e-5
MASK_NEG = -1e30     # finite "minus infinity" (avoids inf-inf NaN on all-masked rows)


# ---------------------------- kernel helpers ---------------------------------
def _layernorm(x, gamma, beta):
    mu = jnp.mean(x, axis=-1, keepdims=True)
    var = jnp.mean((x - mu) ** 2, axis=-1, keepdims=True)
    return (x - mu) * jax.lax.rsqrt(var + LN_EPS) * gamma + beta


def _gelu_exact(x):
    # torch.nn.GELU() default = exact erf formulation (kept for parity).
    # TODO(synk): tanh-GELU would use the EUP slot, but changes numerics vs PyTorch.
    return 0.5 * x * (1.0 + jax.lax.erf(x * (1.0 / math.sqrt(2.0))))


# ------------------------------ Pallas kernel --------------------------------
def encode_block_kernel(
    x_ref,        # (BB, L, D)   block of batch elements
    mask_ref,     # (BB, L, L)   raw attention masks (0 = masked)
    wqkv_ref,     # (D, 3D)      fused QKV weight (q part pre-scaled)
    bqkv_ref,     # (1, 3D)      fused QKV bias   (q part pre-scaled)
    wp_ref,       # (D, D)       output-projection weight
    w12_ref,      # (2, D, D)    MLP weights [w1, w2]
    vec_ref,      # (7, D)       [bp, g1, be1, b1, b2, g2, be2]
    out_ref,      # (BB, L*D)    lane-dense output block
):
    BB, L, D = x_ref.shape
    N = BB * L
    H, dh = N_HEAD, HEAD_DIM

    x = x_ref[...].reshape(N, D)        # row-wise slab for all dense ops
    vec = vec_ref[...]                  # (7, D)

    # mask -> additive bias on VMEM-resident data (no extra HBM round trip)
    bias = jnp.where(mask_ref[...] == 0.0,
                     jnp.float32(MASK_NEG), jnp.float32(0.0))          # (BB, L, L)

    # ---- fused QKV projection: single MXU push, 96-lane output ----
    qkv = jnp.dot(x, wqkv_ref[...], preferred_element_type=jnp.float32) + bqkv_ref[...]
    q = qkv[:, :D]          # already scaled by 1/sqrt(head_dim)
    k = qkv[:, D:2 * D]
    v = qkv[:, 2 * D:]

    # ---- fold heads into the batch axis: (H*BB, L, dh) ----
    def to_heads(z):
        return jnp.concatenate(
            [z[:, h * dh:(h + 1) * dh].reshape(BB, L, dh) for h in range(H)], axis=0)

    qs = to_heads(q)
    ks = to_heads(k)
    vs = to_heads(v)
    bias_hb = jnp.concatenate([bias] * H, axis=0)                       # (H*BB, L, L)

    # ---- ONE masked-softmax attention over all heads & batch elements ----
    att = jnp.einsum("bqd,bkd->bqk", qs, ks,
                     preferred_element_type=jnp.float32)                # (H*BB, L, L)
    att = att + bias_hb
    att = att - jnp.max(att, axis=-1, keepdims=True)
    p = jnp.exp(att)
    p = p * pl.reciprocal(jnp.sum(p, axis=-1, keepdims=True), approx=True)

    y = jnp.einsum("bqk,bkd->bqd", p, vs,
                   preferred_element_type=jnp.float32)                  # (H*BB, L, dh)

    # heads back to the lane axis (cheap in-vreg concat), then ONE (N,D)x(D,D) proj
    y_cat = jnp.concatenate(
        [y[h * BB:(h + 1) * BB].reshape(N, dh) for h in range(H)], axis=-1)   # (N, D)
    attn_out = jnp.dot(y_cat, wp_ref[...],
                       preferred_element_type=jnp.float32) + vec[0:1]   # + bp

    # ---- residual + LayerNorm 1 ----
    x1 = _layernorm(x + attn_out, vec[1:2], vec[2:3])

    # ---- MLP: Linear -> exact GELU -> Linear ----
    h1 = _gelu_exact(jnp.dot(x1, w12_ref[0], preferred_element_type=jnp.float32) + vec[3:4])
    mlp = jnp.dot(h1, w12_ref[1], preferred_element_type=jnp.float32) + vec[4:5]

    # ---- residual + LayerNorm 2 ----
    out = _layernorm(x1 + mlp, vec[5:6], vec[6:7])

    # ---- lane-dense store: (BB, L*D) => unmasked 128-lane stores / dense DMA ----
    out3 = out.reshape(BB, L, D)
    out_ref[...] = jnp.concatenate([out3[:, l, :] for l in range(L)],
                                   axis=-1).astype(out_ref.dtype)


# ------------------------------ wrapper ---------------------------------------
def pack_params(params):
    """Host-side parameter packing. Call ONCE per parameter set and reuse."""
    scale = jnp.float32(1.0 / math.sqrt(HEAD_DIM))
    return {
        "wqkv": jnp.concatenate([params["wq"] * scale, params["wk"], params["wv"]], axis=1),
        "bqkv": jnp.concatenate([params["bq"] * scale, params["bk"], params["bv"]], axis=1),
        "wp": params["wp"],
        "w12": jnp.stack([params["w1"], params["w2"]], axis=0),
        "vecs": jnp.concatenate([params["bp"], params["g1"], params["be1"],
                                 params["b1"], params["b2"], params["g2"],
                                 params["be2"]], axis=0),
    }


def _pick_block_b(B):
    # Tiny B: collapse the grid (per-step overhead dominates; full-dim blocks
    # keep every BlockSpec trivially legal).  Larger B: multiple-of-8 batch
    # blocks targeting ~1024 rows per step (block_b <= 128) with >= 2 grid
    # steps so both v7x TensorCores get work.  VMEM per step at block_b = 128
    # is ~3 MiB double-buffered -> far under the scoped limit on v5e/v6e/v7x.
    if B < 16:
        return B
    target = min(128, B // 2)
    best = None
    for cand in range(8, target + 1, 8):
        if B % cand == 0:
            best = cand
    return best if best is not None else B


def encode_block(x, atten_masks, packed, block_b=None):
    B, L, D = x.shape
    if block_b is None:
        block_b = _pick_block_b(B)
    assert B % block_b == 0, "batch must be divisible by the batch block"
    assert block_b == B or block_b % 8 == 0, "block_b must be B or a multiple of 8"
    grid = (B // block_b,)

    in_specs = [
        pl.BlockSpec((block_b, L, D), lambda b: (b, 0, 0)),     # x block
        pl.BlockSpec((block_b, L, L), lambda b: (b, 0, 0)),     # raw mask block
        pl.BlockSpec((D, 3 * D), lambda b: (0, 0)),             # wqkv (replicated)
        pl.BlockSpec((1, 3 * D), lambda b: (0, 0)),             # bqkv
        pl.BlockSpec((D, D), lambda b: (0, 0)),                 # wp
        pl.BlockSpec((2, D, D), lambda b: (0, 0, 0)),           # w1 | w2
        pl.BlockSpec((7, D), lambda b: (0, 0)),                 # packed vectors
    ]
    out_spec = pl.BlockSpec((block_b, L * D), lambda b: (b, 0))  # lane-dense output

    out = pl.pallas_call(
        encode_block_kernel,
        out_shape=jax.ShapeDtypeStruct((B, L * D), jnp.float32),
        grid_spec=pltpu.PrefetchScalarGridSpec(
            num_scalar_prefetch=0,
            grid=grid,
            in_specs=in_specs,
            out_specs=out_spec,
        ),
        compiler_params=pltpu.CompilerParams(
            dimension_semantics=("parallel",)),
    )(x, atten_masks, packed["wqkv"], packed["bqkv"], packed["wp"],
      packed["w12"], packed["vecs"])
    return out.reshape(B, L, D)


# --------------------------- pure-JAX reference --------------------------------
def encode_block_ref(x, mask, p):
    def ln(z, g, b):
        mu = z.mean(-1, keepdims=True)
        var = ((z - mu) ** 2).mean(-1, keepdims=True)
        return (z - mu) / jnp.sqrt(var + LN_EPS) * g + b

    B, L, D = x.shape
    H, dh = N_HEAD, HEAD_DIM
    q = (x @ p["wq"] + p["bq"]).reshape(B, L, H, dh).transpose(0, 2, 1, 3)
    k = (x @ p["wk"] + p["bk"]).reshape(B, L, H, dh).transpose(0, 2, 1, 3)
    v = (x @ p["wv"] + p["bv"]).reshape(B, L, H, dh).transpose(0, 2, 1, 3)
    att = jnp.einsum("bhqd,bhkd->bhqk", q, k) / math.sqrt(dh)
    att = jnp.where(mask[:, None] == 0, -jnp.inf, att)
    att = jax.nn.softmax(att, axis=-1)
    y = jnp.einsum("bhqk,bhkd->bhqd", att, v).transpose(0, 2, 1, 3).reshape(B, L, D)
    y = y @ p["wp"] + p["bp"]
    x1 = ln(x + y, p["g1"], p["be1"])
    pre = x1 @ p["w1"] + p["b1"]
    h1 = 0.5 * pre * (1.0 + jax.lax.erf(pre / math.sqrt(2.0)))
    mlp = h1 @ p["w2"] + p["b2"]
    return ln(x1 + mlp, p["g2"], p["be2"])


# ----------------------------- param init --------------------------------------
def make_params(key, n_embd):
    # Deterministic synthetic init (module uses orthogonal weights / zero biases;
    # the exact init scheme is irrelevant for kernel semantics).
    ks = jax.random.split(key, 10)
    w = lambda k: jax.random.normal(k, (n_embd, n_embd), jnp.float32) * 0.05
    b = lambda k: jax.random.normal(k, (1, n_embd), jnp.float32) * 0.01
    return {
        "wq": w(ks[0]), "bq": b(ks[0]),
        "wk": w(ks[1]), "bk": b(ks[1]),
        "wv": w(ks[2]), "bv": b(ks[2]),
        "wp": w(ks[3]), "bp": b(ks[3]),
        "g1": jnp.ones((1, n_embd), jnp.float32) + 0.1 * jax.random.normal(ks[4], (1, n_embd)),
        "be1": 0.1 * jax.random.normal(ks[5], (1, n_embd), jnp.float32),
        "w1": w(ks[6]), "b1": b(ks[6]),
        "w2": w(ks[7]), "b2": b(ks[7]),
        "g2": jnp.ones((1, n_embd), jnp.float32) + 0.1 * jax.random.normal(ks[8], (1, n_embd)),
        "be2": 0.1 * jax.random.normal(ks[9], (1, n_embd), jnp.float32),
    }


if __name__ == "__main__":
    key = jax.random.PRNGKey(0)
    kx, kp = jax.random.split(key)

    B, L, D = 2, N_AGENT, N_EMBD
    x = jax.random.normal(kx, (B, L, D), jnp.float32)

    # attention masks (B, L, L): batch 0 causal (lower-triangular), batch 1 full.
    tril = jnp.tril(jnp.ones((L, L), jnp.float32))
    atten_masks = jnp.stack([tril, jnp.ones((L, L), jnp.float32)], axis=0)

    params = make_params(kp, D)
    packed = pack_params(params)               # packed ONCE, reused across calls

    # TODO(synk): the SelfAttention KV-cache path (start_pos >= 0) is unused by
    # EncodeBlock.forward and is not implemented here.
    fwd = jax.jit(lambda a, m: encode_block(a, m, packed))
    out = jax.block_until_ready(fwd(x, atten_masks))

    ref = encode_block_ref(x, atten_masks, params)
    # Tolerance 1e-3: dominated by the EUP approx reciprocal (~2^-12 rel err)
    # in the softmax normalization; everything else is f32-exact order changes.
    np.testing.assert_allclose(np.asarray(out), np.asarray(ref), rtol=1e-3, atol=1e-3)

    print("KERNEL_OK")
</pallas_src>

<mosaic_0001>
module attributes {stable_mosaic.version = 11 : i64} {
  func.func @encode_block_kernel(%arg0: i32, %arg1: memref<2x8x32xf32, #tpu.memory_space<vmem>>, %arg2: memref<2x8x8xf32, #tpu.memory_space<vmem>>, %arg3: memref<32x96xf32, #tpu.memory_space<vmem>>, %arg4: memref<1x96xf32, #tpu.memory_space<vmem>>, %arg5: memref<32x32xf32, #tpu.memory_space<vmem>>, %arg6: memref<2x32x32xf32, #tpu.memory_space<vmem>>, %arg7: memref<7x32xf32, #tpu.memory_space<vmem>>, %arg8: memref<2x256xf32, #tpu.memory_space<vmem>>) attributes {dimension_semantics = [#tpu.dimension_semantics<parallel>], iteration_bounds = array<i64: 1>, scalar_prefetch = 0 : i64, scratch_operands = 0 : i64, tpu.core_type = #tpu.core_type<tc>, window_params = [{transform_indices = @transform_0, window_bounds = array<i64: 2, 8, 32>}, {transform_indices = @transform_1, window_bounds = array<i64: 2, 8, 8>}, {pipeline_mode = #tpu.pipeline_mode<synchronous>, transform_indices = @transform_2, window_bounds = array<i64: 32, 96>}, {pipeline_mode = #tpu.pipeline_mode<synchronous>, transform_indices = @transform_3, window_bounds = array<i64: 1, 96>}, {pipeline_mode = #tpu.pipeline_mode<synchronous>, transform_indices = @transform_4, window_bounds = array<i64: 32, 32>}, {pipeline_mode = #tpu.pipeline_mode<synchronous>, transform_indices = @transform_5, window_bounds = array<i64: 2, 32, 32>}, {pipeline_mode = #tpu.pipeline_mode<synchronous>, transform_indices = @transform_6, window_bounds = array<i64: 7, 32>}, {transform_indices = @transform_7, window_bounds = array<i64: 2, 256>}]} {
    %c0 = arith.constant 0 : index
    %c0_0 = arith.constant 0 : index
    %c0_1 = arith.constant 0 : index
    %0 = vector.load %arg1[%c0, %c0_0, %c0_1] : memref<2x8x32xf32, #tpu.memory_space<vmem>>, vector<2x8x32xf32>
    %1 = vector.shape_cast %0 : vector<2x8x32xf32> to vector<16x32xf32>
    %c0_2 = arith.constant 0 : index
    %c0_3 = arith.constant 0 : index
    %2 = vector.load %arg7[%c0_2, %c0_3] : memref<7x32xf32, #tpu.memory_space<vmem>>, vector<7x32xf32>
    %c0_4 = arith.constant 0 : index
    %c0_5 = arith.constant 0 : index
    %c0_6 = arith.constant 0 : index
    %3 = vector.load %arg2[%c0_4, %c0_5, %c0_6] : memref<2x8x8xf32, #tpu.memory_space<vmem>>, vector<2x8x8xf32>
    %cst = arith.constant 0.000000e+00 : f32
    %4 = vector.broadcast %cst : f32 to vector<2x8x8xf32>
    %5 = arith.cmpf oeq, %3, %4 : vector<2x8x8xf32>
    %cst_7 = arith.constant -1.000000e+30 : f32
    %cst_8 = arith.constant 0.000000e+00 : f32
    %6 = vector.broadcast %cst_7 : f32 to vector<2x8x8xf32>
    %7 = vector.broadcast %cst_8 : f32 to vector<2x8x8xf32>
    %8 = arith.select %5, %6, %7 : vector<2x8x8xi1>, vector<2x8x8xf32>
    %c0_9 = arith.constant 0 : index
    %c0_10 = arith.constant 0 : index
    %9 = vector.load %arg3[%c0_9, %c0_10] : memref<32x96xf32, #tpu.memory_space<vmem>>, vector<32x96xf32>
    %cst_11 = arith.constant dense<0.000000e+00> : vector<16x96xf32>
    %10 = tpu.matmul %1, %9, %cst_11 {dimension_numbers = #tpu.dot_dimension_numbers<[1], [0], [0], [1], [0, 0, 1, 1], [], []>} : vector<16x32xf32>, vector<32x96xf32>, vector<16x96xf32> -> vector<16x96xf32>
    %c0_12 = arith.constant 0 : index
    %c0_13 = arith.constant 0 : index
    %11 = vector.load %arg4[%c0_12, %c0_13] : memref<1x96xf32, #tpu.memory_space<vmem>>, vector<1x96xf32>
    %12 = vector.broadcast %11 : vector<1x96xf32> to vector<16x96xf32>
    %13 = arith.addf %10, %12 : vector<16x96xf32>
    %14 = vector.extract_strided_slice %13 {offsets = [0, 0], sizes = [16, 32], strides = [1, 1]} : vector<16x96xf32> to vector<16x32xf32>
    %15 = vector.extract_strided_slice %13 {offsets = [0, 32], sizes = [16, 32], strides = [1, 1]} : vector<16x96xf32> to vector<16x32xf32>
    %16 = vector.extract_strided_slice %13 {offsets = [0, 64], sizes = [16, 32], strides = [1, 1]} : vector<16x96xf32> to vector<16x32xf32>
    %17 = vector.extract_strided_slice %14 {offsets = [0, 0], sizes = [16, 8], strides = [1, 1]} : vector<16x32xf32> to vector<16x8xf32>
    %18 = vector.shape_cast %17 : vector<16x8xf32> to vector<2x8x8xf32>
    %19 = vector.extract_strided_slice %14 {offsets = [0, 8], sizes = [16, 8], strides = [1, 1]} : vector<16x32xf32> to vector<16x8xf32>
    %20 = vector.shape_cast %19 : vector<16x8xf32> to vector<2x8x8xf32>
    %21 = vector.extract_strided_slice %14 {offsets = [0, 16], sizes = [16, 8], strides = [1, 1]} : vector<16x32xf32> to vector<16x8xf32>
    %22 = vector.shape_cast %21 : vector<16x8xf32> to vector<2x8x8xf32>
    %23 = vector.extract_strided_slice %14 {offsets = [0, 24], sizes = [16, 8], strides = [1, 1]} : vector<16x32xf32> to vector<16x8xf32>
    %24 = vector.shape_cast %23 : vector<16x8xf32> to vector<2x8x8xf32>
    %25 = tpu.concatenate %18, %20, %22, %24 in 0 : vector<2x8x8xf32>, vector<2x8x8xf32>, vector<2x8x8xf32>, vector<2x8x8xf32> -> vector<8x8x8xf32>
    %26 = vector.extract_strided_slice %15 {offsets = [0, 0], sizes = [16, 8], strides = [1, 1]} : vector<16x32xf32> to vector<16x8xf32>
    %27 = vector.shape_cast %26 : vector<16x8xf32> to vector<2x8x8xf32>
    %28 = vector.extract_strided_slice %15 {offsets = [0, 8], sizes = [16, 8], strides = [1, 1]} : vector<16x32xf32> to vector<16x8xf32>
    %29 = vector.shape_cast %28 : vector<16x8xf32> to vector<2x8x8xf32>
    %30 = vector.extract_strided_slice %15 {offsets = [0, 16], sizes = [16, 8], strides = [1, 1]} : vector<16x32xf32> to vector<16x8xf32>
    %31 = vector.shape_cast %30 : vector<16x8xf32> to vector<2x8x8xf32>
    %32 = vector.extract_strided_slice %15 {offsets = [0, 24], sizes = [16, 8], strides = [1, 1]} : vector<16x32xf32> to vector<16x8xf32>
    %33 = vector.shape_cast %32 : vector<16x8xf32> to vector<2x8x8xf32>
    %34 = tpu.concatenate %27, %29, %31, %33 in 0 : vector<2x8x8xf32>, vector<2x8x8xf32>, vector<2x8x8xf32>, vector<2x8x8xf32> -> vector<8x8x8xf32>
    %35 = vector.extract_strided_slice %16 {offsets = [0, 0], sizes = [16, 8], strides = [1, 1]} : vector<16x32xf32> to vector<16x8xf32>
    %36 = vector.shape_cast %35 : vector<16x8xf32> to vector<2x8x8xf32>
    %37 = vector.extract_strided_slice %16 {offsets = [0, 8], sizes = [16, 8], strides = [1, 1]} : vector<16x32xf32> to vector<16x8xf32>
    %38 = vector.shape_cast %37 : vector<16x8xf32> to vector<2x8x8xf32>
    %39 = vector.extract_strided_slice %16 {offsets = [0, 16], sizes = [16, 8], strides = [1, 1]} : vector<16x32xf32> to vector<16x8xf32>
    %40 = vector.shape_cast %39 : vector<16x8xf32> to vector<2x8x8xf32>
    %41 = vector.extract_strided_slice %16 {offsets = [0, 24], sizes = [16, 8], strides = [1, 1]} : vector<16x32xf32> to vector<16x8xf32>
    %42 = vector.shape_cast %41 : vector<16x8xf32> to vector<2x8x8xf32>
    %43 = tpu.concatenate %36, %38, %40, %42 in 0 : vector<2x8x8xf32>, vector<2x8x8xf32>, vector<2x8x8xf32>, vector<2x8x8xf32> -> vector<8x8x8xf32>
    %44 = tpu.concatenate %8, %8, %8, %8 in 0 : vector<2x8x8xf32>, vector<2x8x8xf32>, vector<2x8x8xf32>, vector<2x8x8xf32> -> vector<8x8x8xf32>
    "tpu.trace_start"() <{level = 10 : i32, message = "bqd,bkd->bqk"}> : () -> ()
    %cst_14 = arith.constant dense<0.000000e+00> : vector<8x8x8xf32>
    %45 = tpu.matmul %25, %34, %cst_14 {dimension_numbers = #tpu.dot_dimension_numbers<[2], [2], [1], [1], [0, 0, 0, 1, 1, 1], [0], [0]>} : vector<8x8x8xf32>, vector<8x8x8xf32>, vector<8x8x8xf32> -> vector<8x8x8xf32>
    "tpu.trace_stop"() : () -> ()
    %46 = arith.addf %45, %44 : vector<8x8x8xf32>
    %cst_15 = arith.constant dense<0xFF800000> : vector<8x8xf32>
    %47 = vector.multi_reduction <maximumf>, %46, %cst_15 [2] : vector<8x8x8xf32> to vector<8x8xf32>
    %48 = vector.shape_cast %47 : vector<8x8xf32> to vector<8x8x1xf32>
    %49 = vector.broadcast %48 : vector<8x8x1xf32> to vector<8x8x8xf32>
    %50 = arith.subf %46, %49 : vector<8x8x8xf32>
    %51 = math.exp %50 : vector<8x8x8xf32>
    %cst_16 = arith.constant dense<0.000000e+00> : vector<8x8xf32>
    %52 = vector.multi_reduction <add>, %51, %cst_16 [2] : vector<8x8x8xf32> to vector<8x8xf32>
    %53 = vector.shape_cast %52 : vector<8x8xf32> to vector<8x8x1xf32>
    %54 = tpu.reciprocal %53 {approx = true} : vector<8x8x1xf32> -> vector<8x8x1xf32>
    %55 = vector.broadcast %54 : vector<8x8x1xf32> to vector<8x8x8xf32>
    %56 = arith.mulf %51, %55 : vector<8x8x8xf32>
    "tpu.trace_start"() <{level = 10 : i32, message = "bqk,bkd->bqd"}> : () -> ()
    %cst_17 = arith.constant dense<0.000000e+00> : vector<8x8x8xf32>
    %57 = tpu.matmul %56, %43, %cst_17 {dimension_numbers = #tpu.dot_dimension_numbers<[2], [1], [1], [2], [0, 0, 0, 1, 1, 2], [0], [0]>} : vector<8x8x8xf32>, vector<8x8x8xf32>, vector<8x8x8xf32> -> vector<8x8x8xf32>
    "tpu.trace_stop"() : () -> ()
    %58 = vector.extract_strided_slice %57 {offsets = [0, 0, 0], sizes = [2, 8, 8], strides = [1, 1, 1]} : vector<8x8x8xf32> to vector<2x8x8xf32>
    %59 = vector.shape_cast %58 : vector<2x8x8xf32> to vector<16x8xf32>
    %60 = vector.extract_strided_slice %57 {offsets = [2, 0, 0], sizes = [2, 8, 8], strides = [1, 1, 1]} : vector<8x8x8xf32> to vector<2x8x8xf32>
    %61 = vector.shape_cast %60 : vector<2x8x8xf32> to vector<16x8xf32>
    %62 = vector.extract_strided_slice %57 {offsets = [4, 0, 0], sizes = [2, 8, 8], strides = [1, 1, 1]} : vector<8x8x8xf32> to vector<2x8x8xf32>
    %63 = vector.shape_cast %62 : vector<2x8x8xf32> to vector<16x8xf32>
    %64 = vector.extract_strided_slice %57 {offsets = [6, 0, 0], sizes = [2, 8, 8], strides = [1, 1, 1]} : vector<8x8x8xf32> to vector<2x8x8xf32>
    %65 = vector.shape_cast %64 : vector<2x8x8xf32> to vector<16x8xf32>
    %66 = tpu.concatenate %59, %61, %63, %65 in 1 : vector<16x8xf32>, vector<16x8xf32>, vector<16x8xf32>, vector<16x8xf32> -> vector<16x32xf32>
    %c0_18 = arith.constant 0 : index
    %c0_19 = arith.constant 0 : index
    %67 = vector.load %arg5[%c0_18, %c0_19] : memref<32x32xf32, #tpu.memory_space<vmem>>, vector<32x32xf32>
    %cst_20 = arith.constant dense<0.000000e+00> : vector<16x32xf32>
    %68 = tpu.matmul %66, %67, %cst_20 {dimension_numbers = #tpu.dot_dimension_numbers<[1], [0], [0], [1], [0, 0, 1, 1], [], []>} : vector<16x32xf32>, vector<32x32xf32>, vector<16x32xf32> -> vector<16x32xf32>
    %69 = vector.extract_strided_slice %2 {offsets = [0, 0], sizes = [1, 32], strides = [1, 1]} : vector<7x32xf32> to vector<1x32xf32>
    %70 = vector.broadcast %69 : vector<1x32xf32> to vector<16x32xf32>
    %71 = arith.addf %68, %70 : vector<16x32xf32>
    %72 = arith.addf %1, %71 : vector<16x32xf32>
    %73 = vector.extract_strided_slice %2 {offsets = [1, 0], sizes = [1, 32], strides = [1, 1]} : vector<7x32xf32> to vector<1x32xf32>
    %74 = vector.extract_strided_slice %2 {offsets = [2, 0], sizes = [1, 32], strides = [1, 1]} : vector<7x32xf32> to vector<1x32xf32>
    %cst_21 = arith.constant dense<0.000000e+00> : vector<16xf32>
    %75 = vector.multi_reduction <add>, %72, %cst_21 [1] : vector<16x32xf32> to vector<16xf32>
    %76 = vector.shape_cast %75 : vector<16xf32> to vector<16x1xf32>
    %cst_22 = arith.constant 3.200000e+01 : f32
    %77 = vector.broadcast %cst_22 : f32 to vector<16x1xf32>
    %78 = arith.divf %76, %77 : vector<16x1xf32>
    %79 = vector.broadcast %78 : vector<16x1xf32> to vector<16x32xf32>
    %80 = arith.subf %72, %79 : vector<16x32xf32>
    %81 = arith.mulf %80, %80 : vector<16x32xf32>
    %cst_23 = arith.constant dense<0.000000e+00> : vector<16xf32>
    %82 = vector.multi_reduction <add>, %81, %cst_23 [1] : vector<16x32xf32> to vector<16xf32>
    %83 = vector.shape_cast %82 : vector<16xf32> to vector<16x1xf32>
    %cst_24 = arith.constant 3.200000e+01 : f32
    %84 = vector.broadcast %cst_24 : f32 to vector<16x1xf32>
    %85 = arith.divf %83, %84 : vector<16x1xf32>
    %86 = vector.broadcast %78 : vector<16x1xf32> to vector<16x32xf32>
    %87 = arith.subf %72, %86 : vector<16x32xf32>
    %cst_25 = arith.constant 9.99999974E-6 : f32
    %88 = vector.broadcast %cst_25 : f32 to vector<16x1xf32>
    %89 = arith.addf %85, %88 : vector<16x1xf32>
    %90 = math.rsqrt %89 : vector<16x1xf32>
    %91 = vector.broadcast %90 : vector<16x1xf32> to vector<16x32xf32>
    %92 = arith.mulf %87, %91 : vector<16x32xf32>
    %93 = vector.broadcast %73 : vector<1x32xf32> to vector<16x32xf32>
    %94 = arith.mulf %92, %93 : vector<16x32xf32>
    %95 = vector.broadcast %74 : vector<1x32xf32> to vector<16x32xf32>
    %96 = arith.addf %94, %95 : vector<16x32xf32>
    %c0_26 = arith.constant 0 : index
    %c0_27 = arith.constant 0 : index
    %c0_28 = arith.constant 0 : index
    %97 = vector.load %arg6[%c0_26, %c0_27, %c0_28] : memref<2x32x32xf32, #tpu.memory_space<vmem>>, vector<1x32x32xf32>
    %98 = vector.shape_cast %97 : vector<1x32x32xf32> to vector<32x32xf32>
    %cst_29 = arith.constant dense<0.000000e+00> : vector<16x32xf32>
    %99 = tpu.matmul %96, %98, %cst_29 {dimension_numbers = #tpu.dot_dimension_numbers<[1], [0], [0], [1], [0, 0, 1, 1], [], []>} : vector<16x32xf32>, vector<32x32xf32>, vector<16x32xf32> -> vector<16x32xf32>
    %100 = vector.extract_strided_slice %2 {offsets = [3, 0], sizes = [1, 32], strides = [1, 1]} : vector<7x32xf32> to vector<1x32xf32>
    %101 = vector.broadcast %100 : vector<1x32xf32> to vector<16x32xf32>
    %102 = arith.addf %99, %101 : vector<16x32xf32>
    %cst_30 = arith.constant 5.000000e-01 : f32
    %103 = vector.broadcast %cst_30 : f32 to vector<16x32xf32>
    %104 = arith.mulf %103, %102 : vector<16x32xf32>
    %cst_31 = arith.constant 0.707106769 : f32
    %105 = vector.broadcast %cst_31 : f32 to vector<16x32xf32>
    %106 = arith.mulf %102, %105 : vector<16x32xf32>
    %107 = math.erf %106 : vector<16x32xf32>
    %cst_32 = arith.constant 1.000000e+00 : f32
    %108 = vector.broadcast %cst_32 : f32 to vector<16x32xf32>
    %109 = arith.addf %108, %107 : vector<16x32xf32>
    %110 = arith.mulf %104, %109 : vector<16x32xf32>
    %c1 = arith.constant 1 : index
    %c0_33 = arith.constant 0 : index
    %c0_34 = arith.constant 0 : index
    %111 = vector.load %arg6[%c1, %c0_33, %c0_34] : memref<2x32x32xf32, #tpu.memory_space<vmem>>, vector<1x32x32xf32>
    %112 = vector.shape_cast %111 : vector<1x32x32xf32> to vector<32x32xf32>
    %cst_35 = arith.constant dense<0.000000e+00> : vector<16x32xf32>
    %113 = tpu.matmul %110, %112, %cst_35 {dimension_numbers = #tpu.dot_dimension_numbers<[1], [0], [0], [1], [0, 0, 1, 1], [], []>} : vector<16x32xf32>, vector<32x32xf32>, vector<16x32xf32> -> vector<16x32xf32>
    %114 = vector.extract_strided_slice %2 {offsets = [4, 0], sizes = [1, 32], strides = [1, 1]} : vector<7x32xf32> to vector<1x32xf32>
    %115 = vector.broadcast %114 : vector<1x32xf32> to vector<16x32xf32>
    %116 = arith.addf %113, %115 : vector<16x32xf32>
    %117 = arith.addf %96, %116 : vector<16x32xf32>
    %118 = vector.extract_strided_slice %2 {offsets = [5, 0], sizes = [1, 32], strides = [1, 1]} : vector<7x32xf32> to vector<1x32xf32>
    %119 = vector.extract_strided_slice %2 {offsets = [6, 0], sizes = [1, 32], strides = [1, 1]} : vector<7x32xf32> to vector<1x32xf32>
    %cst_36 = arith.constant dense<0.000000e+00> : vector<16xf32>
    %120 = vector.multi_reduction <add>, %117, %cst_36 [1] : vector<16x32xf32> to vector<16xf32>
    %121 = vector.shape_cast %120 : vector<16xf32> to vector<16x1xf32>
    %cst_37 = arith.constant 3.200000e+01 : f32
    %122 = vector.broadcast %cst_37 : f32 to vector<16x1xf32>
    %123 = arith.divf %121, %122 : vector<16x1xf32>
    %124 = vector.broadcast %123 : vector<16x1xf32> to vector<16x32xf32>
    %125 = arith.subf %117, %124 : vector<16x32xf32>
    %126 = arith.mulf %125, %125 : vector<16x32xf32>
    %cst_38 = arith.constant dense<0.000000e+00> : vector<16xf32>
    %127 = vector.multi_reduction <add>, %126, %cst_38 [1] : vector<16x32xf32> to vector<16xf32>
    %128 = vector.shape_cast %127 : vector<16xf32> to vector<16x1xf32>
    %cst_39 = arith.constant 3.200000e+01 : f32
    %129 = vector.broadcast %cst_39 : f32 to vector<16x1xf32>
    %130 = arith.divf %128, %129 : vector<16x1xf32>
    %131 = vector.broadcast %123 : vector<16x1xf32> to vector<16x32xf32>
    %132 = arith.subf %117, %131 : vector<16x32xf32>
    %cst_40 = arith.constant 9.99999974E-6 : f32
    %133 = vector.broadcast %cst_40 : f32 to vector<16x1xf32>
    %134 = arith.addf %130, %133 : vector<16x1xf32>
    %135 = math.rsqrt %134 : vector<16x1xf32>
    %136 = vector.broadcast %135 : vector<16x1xf32> to vector<16x32xf32>
    %137 = arith.mulf %132, %136 : vector<16x32xf32>
    %138 = vector.broadcast %118 : vector<1x32xf32> to vector<16x32xf32>
    %139 = arith.mulf %137, %138 : vector<16x32xf32>
    %140 = vector.broadcast %119 : vector<1x32xf32> to vector<16x32xf32>
    %141 = arith.addf %139, %140 : vector<16x32xf32>
    %142 = vector.shape_cast %141 : vector<16x32xf32> to vector<2x8x32xf32>
    %143 = vector.extract_strided_slice %142 {offsets = [0, 0, 0], sizes = [2, 1, 32], strides = [1, 1, 1]} : vector<2x8x32xf32> to vector<2x1x32xf32>
    %144 = vector.shape_cast %143 : vector<2x1x32xf32> to vector<2x32xf32>
    %145 = vector.extract_strided_slice %142 {offsets = [0, 1, 0], sizes = [2, 1, 32], strides = [1, 1, 1]} : vector<2x8x32xf32> to vector<2x1x32xf32>
    %146 = vector.shape_cast %145 : vector<2x1x32xf32> to vector<2x32xf32>
    %147 = vector.extract_strided_slice %142 {offsets = [0, 2, 0], sizes = [2, 1, 32], strides = [1, 1, 1]} : vector<2x8x32xf32> to vector<2x1x32xf32>
    %148 = vector.shape_cast %147 : vector<2x1x32xf32> to vector<2x32xf32>
    %149 = vector.extract_strided_slice %142 {offsets = [0, 3, 0], sizes = [2, 1, 32], strides = [1, 1, 1]} : vector<2x8x32xf32> to vector<2x1x32xf32>
    %150 = vector.shape_cast %149 : vector<2x1x32xf32> to vector<2x32xf32>
    %151 = vector.extract_strided_slice %142 {offsets = [0, 4, 0], sizes = [2, 1, 32], strides = [1, 1, 1]} : vector<2x8x32xf32> to vector<2x1x32xf32>
    %152 = vector.shape_cast %151 : vector<2x1x32xf32> to vector<2x32xf32>
    %153 = vector.extract_strided_slice %142 {offsets = [0, 5, 0], sizes = [2, 1, 32], strides = [1, 1, 1]} : vector<2x8x32xf32> to vector<2x1x32xf32>
    %154 = vector.shape_cast %153 : vector<2x1x32xf32> to vector<2x32xf32>
    %155 = vector.extract_strided_slice %142 {offsets = [0, 6, 0], sizes = [2, 1, 32], strides = [1, 1, 1]} : vector<2x8x32xf32> to vector<2x1x32xf32>
    %156 = vector.shape_cast %155 : vector<2x1x32xf32> to vector<2x32xf32>
    %157 = vector.extract_strided_slice %142 {offsets = [0, 7, 0], sizes = [2, 1, 32], strides = [1, 1, 1]} : vector<2x8x32xf32> to vector<2x1x32xf32>
    %158 = vector.shape_cast %157 : vector<2x1x32xf32> to vector<2x32xf32>
    %159 = tpu.concatenate %144, %146, %148, %150, %152, %154, %156, %158 in 1 : vector<2x32xf32>, vector<2x32xf32>, vector<2x32xf32>, vector<2x32xf32>, vector<2x32xf32>, vector<2x32xf32>, vector<2x32xf32>, vector<2x32xf32> -> vector<2x256xf32>
    %c0_41 = arith.constant 0 : index
    %c0_42 = arith.constant 0 : index
    %160 = vector.load %arg8[%c0_41, %c0_42] : memref<2x256xf32, #tpu.memory_space<vmem>>, vector<2x256xf32>
    tpu.vector_store %arg8[%c0_41, %c0_42], %159 {strides = array<i32>} : memref<2x256xf32, #tpu.memory_space<vmem>>, vector<2x256xf32>,
    return
  }
  func.func @transform_0(%arg0: i32) -> (i32, i32, i32) {
    %c0_i32 = arith.constant 0 : i32
    %c0_i32_0 = arith.constant 0 : i32
    %c0_i32_1 = arith.constant 0 : i32
    return %arg0, %c0_i32, %c0_i32_0 : i32, i32, i32
  }
  func.func @transform_1(%arg0: i32) -> (i32, i32, i32) {
    %c0_i32 = arith.constant 0 : i32
    %c0_i32_0 = arith.constant 0 : i32
    %c0_i32_1 = arith.constant 0 : i32
    return %arg0, %c0_i32, %c0_i32_0 : i32, i32, i32
  }
  func.func @transform_2(%arg0: i32) -> (i32, i32) {
    %c0_i32 = arith.constant 0 : i32
    %c0_i32_0 = arith.constant 0 : i32
    %c0_i32_1 = arith.constant 0 : i32
    return %c0_i32, %c0_i32_0 : i32, i32
  }
  func.func @transform_3(%arg0: i32) -> (i32, i32) {
    %c0_i32 = arith.constant 0 : i32
    %c0_i32_0 = arith.constant 0 : i32
    %c0_i32_1 = arith.constant 0 : i32
    return %c0_i32, %c0_i32_0 : i32, i32
  }
  func.func @transform_4(%arg0: i32) -> (i32, i32) {
    %c0_i32 = arith.constant 0 : i32
    %c0_i32_0 = arith.constant 0 : i32
    %c0_i32_1 = arith.constant 0 : i32
    return %c0_i32, %c0_i32_0 : i32, i32
  }
  func.func @transform_5(%arg0: i32) -> (i32, i32, i32) {
    %c0_i32 = arith.constant 0 : i32
    %c0_i32_0 = arith.constant 0 : i32
    %c0_i32_1 = arith.constant 0 : i32
    %c0_i32_2 = arith.constant 0 : i32
    return %c0_i32, %c0_i32_0, %c0_i32_1 : i32, i32, i32
  }
  func.func @transform_6(%arg0: i32) -> (i32, i32) {
    %c0_i32 = arith.constant 0 : i32
    %c0_i32_0 = arith.constant 0 : i32
    %c0_i32_1 = arith.constant 0 : i32
    return %c0_i32, %c0_i32_0 : i32, i32
  }
  func.func @transform_7(%arg0: i32) -> (i32, i32) {
    %c0_i32 = arith.constant 0 : i32
    %c0_i32_0 = arith.constant 0 : i32
    return %arg0, %c0_i32 : i32, i32
  }
}

</mosaic_0001>

<bundles_post_ra>
// kernel: _lambda_.1
= control target key start
LH: loop header
LB: loop body
LE: loop exit
PB: predicated region body
PF: predicated region fallthrough
CT: control target
= control target key end

     0   :  { %12 = vsyncpa [#allocation3], 0  ;;  %s2780_s0 = inlined_call_operand.hbm [shape: f32[2,8,32], index: 0, kind: input, shape index: {}]   ;;  %s2781_s1 = inlined_call_operand.hbm [shape: f32[2,8,8], index: 1, kind: input, shape index: {}]   ;;  %s2782_s2 = inlined_call_operand.hbm [shape: f32[32,96], index: 2, kind: input, shape index: {}]   ;;  %s2783_s3 = inlined_call_operand.vmem [shape: f32[1,96], index: 3, kind: input, shape index: {}]   ;;  %s2784_s4 = inlined_call_operand.hbm [shape: f32[32,32], index: 4, kind: input, shape index: {}]   ;;  %s2785_s5 = inlined_call_operand.hbm [shape: f32[2,32,32], index: 5, kind: input, shape index: {}]   ;;  %s2786_s6 = inlined_call_operand.vmem [shape: f32[7,32], index: 6, kind: input, shape index: {}]   ;;  %s2787_s7 = inlined_call_operand.vmem [shape: f32[2,256], index: 7, kind: output, shape index: {}]  }
   0x1   :  { %13 = vsyncpa [#allocation5], 0 }
   0x2   :  { %14 = vsyncpa [#allocation8], 0  ;;  %s2401_s24 = smov [#allocation4]   ;;  %s2402_s26 = smov [#allocation7]  }
   0x3   :  { %s32_s25 = sshll.u32 %s2401_s24, 4  ;;  %s58_s27 = sshll.u32 %s2402_s26, 4  ;;  %s33_s25 = int_to_ptr.vmem [resolvable:$true] %s32_s25  ;;  %s2458_s27 = int_to_ptr.vmem [resolvable:$true] %s58_s27 }
   0x4   :  { %s2285_s30 = scalar_lea.hbm %s2781_s1, 256 }
   0x5   :  { %p2286_p0 = scmp.ne.s32.totalorder %s2781_s1, %s2285_s30  ;;  %p2289_p1 = scmp.lt.u32.totalorder %s2285_s30, %s2781_s1 }
   0x7   :  { %p2291_p2 = pnand %p2289_p1, %p2286_p0 }
   0x9   :  { %2294 = shalt.err (!%p2291_p2)
}
   0xa   :  { %s2295_s12 = scalar_lea.vmem %s33_s25, 256  ;;  %p2300_p4 = scmp.lt.s32.totalorder %s33_s25, %s33_s25 }
   0xb   :  { %p2296_p3 = scmp.ne.s32.totalorder %s33_s25, %s2295_s12  ;;  %p2301_p5 = scmp.lt.s32.totalorder %s2295_s12, %s2295_s12 }
   0xd   :  { %p2302_p6 = por %p2301_p5, %p2300_p4 }
   0xf   :  { %p2303_p7 = pnand %p2302_p6, %p2296_p3 }
  0x11   :  { %2306 = shalt.err (!%p2303_p7)
}
  0x12   :  { %s2403_s13 = smov 128   ;;  %s2404_s14 = smov 8  }
  0x13   :  { %38 = dma.hbm_to_vmem [thread:$0]  %s2781_s1, 256, %s33_s25, [#allocation5], %s2403_s13, %s2403_s13, %s2404_s14  }
  0x14   :  { %s2307_s19 = scalar_lea.hbm %s2784_s4, 512 }
  0x15   :  { %p2308_p8 = scmp.ne.s32.totalorder %s2784_s4, %s2307_s19  ;;  %p2311_p9 = scmp.lt.u32.totalorder %s2307_s19, %s2784_s4 }
  0x17   :  { %p2313_p10 = pnand %p2311_p9, %p2308_p8 }
  0x19   :  { %2316 = shalt.err (!%p2313_p10)
}
  0x1a   :  { %s2317_s24 = scalar_lea.vmem %s2458_s27, 512  ;;  %p2322_p12 = scmp.lt.s32.totalorder %s2458_s27, %s2458_s27 }
  0x1b   :  { %p2318_p11 = scmp.ne.s32.totalorder %s2458_s27, %s2317_s24  ;;  %p2323_p13 = scmp.lt.s32.totalorder %s2317_s24, %s2317_s24 }
  0x1d   :  { %p2324_p0 = por %p2323_p13, %p2322_p12 }
  0x1f   :  { %p2325_p1 = pnand %p2324_p0, %p2318_p11 }
  0x21   :  { %2328 = shalt.err (!%p2325_p1)
}
  0x22   :  { %64 = dma.hbm_to_vmem [thread:$0]  %s2784_s4, 512, %s2458_s27, [#allocation8], %s2403_s13, %s2403_s13, %s2404_s14  }
  0x23   :  { %s2405_s26 = smov [#allocation2]   ;;  %s2406_s29 = smov [#allocation6]  }
  0x24   :  { %s20_s28 = sshll.u32 %s2405_s26, 4  ;;  %s44_s30 = sshll.u32 %s2406_s29, 4  ;;  %s21_s28 = int_to_ptr.vmem [resolvable:$true] %s20_s28  ;;  %s2495_s30 = int_to_ptr.vmem [resolvable:$true] %s44_s30 }
  0x25   :  { %s2329_s10 = scalar_lea.hbm %s2780_s0, 256 }
  0x26   :  { %p2330_p2 = scmp.ne.s32.totalorder %s2780_s0, %s2329_s10  ;;  %p2333_p3 = scmp.lt.u32.totalorder %s2329_s10, %s2780_s0 }
  0x28   :  { %p2335_p4 = pnand %p2333_p3, %p2330_p2 }
  0x2a   :  { %2338 = shalt.err (!%p2335_p4)
}
  0x2b   :  { %s2339_s4 = scalar_lea.vmem %s21_s28, 256  ;;  %p2344_p6 = scmp.lt.s32.totalorder %s21_s28, %s21_s28 }
  0x2c   :  { %p2340_p5 = scmp.ne.s32.totalorder %s21_s28, %s2339_s4  ;;  %p2345_p7 = scmp.lt.s32.totalorder %s2339_s4, %s2339_s4 }
  0x2e   :  { %p2346_p8 = por %p2345_p7, %p2344_p6 }
  0x30   :  { %p2347_p9 = pnand %p2346_p8, %p2340_p5 }
  0x32   :  { %2350 = shalt.err (!%p2347_p9)
}
  0x33   :  { %26 = dma.hbm_to_vmem [thread:$0]  %s2780_s0, 256, %s21_s28, [#allocation3], %s2403_s13, %s2403_s13, %s2404_s14  }
  0x34   :  { %s2351_s20 = scalar_lea.hbm %s2782_s2, 512 }
  0x35   :  { %p2352_p10 = scmp.ne.s32.totalorder %s2782_s2, %s2351_s20  ;;  %p2355_p11 = scmp.lt.u32.totalorder %s2351_s20, %s2782_s2 }
  0x37   :  { %p2357_p12 = pnand %p2355_p11, %p2352_p10 }
  0x39   :  { %2360 = shalt.err (!%p2357_p12)
}
  0x3a   :  { %s2361_s1 = scalar_lea.vmem %s2495_s30, 512  ;;  %p2366_p0 = scmp.lt.s32.totalorder %s2495_s30, %s2495_s30 }
  0x3b   :  { %p2362_p13 = scmp.ne.s32.totalorder %s2495_s30, %s2361_s1  ;;  %p2367_p1 = scmp.lt.s32.totalorder %s2361_s1, %s2361_s1 }
  0x3d   :  { %p2368_p2 = por %p2367_p1, %p2366_p0 }
  0x3f   :  { %p2369_p3 = pnand %p2368_p2, %p2362_p13 }
  0x41   :  { %2372 = shalt.err (!%p2369_p3)
}
  0x42   :  { %50 = dma.hbm_to_vmem [thread:$0]  %s2782_s2, 512, %s2495_s30, [#allocation5], %s2403_s13, %s2403_s13, %s2404_s14  }
  0x43   :  { %s2407_s26 = smov [#allocation9]   ;;  %s2373_s9 = scalar_lea.hbm %s2785_s5, 1024 }
  0x44   :  { %s70_s28 = sshll.u32 %s2407_s26, 4  ;;  %p2374_p4 = scmp.ne.s32.totalorder %s2785_s5, %s2373_s9  ;;  %s71_s28 = int_to_ptr.vmem [resolvable:$true] %s70_s28 }
  0x45   :  { %p2377_p5 = scmp.lt.u32.totalorder %s2373_s9, %s2785_s5 }
  0x47   :  { %p2379_p6 = pnand %p2377_p5, %p2374_p4 }
  0x49   :  { %2382 = shalt.err (!%p2379_p6)
}
  0x4a   :  { %s2383_s16 = scalar_lea.vmem %s71_s28, 1024  ;;  %p2388_p8 = scmp.lt.s32.totalorder %s71_s28, %s71_s28 }
  0x4b   :  { %p2384_p7 = scmp.ne.s32.totalorder %s71_s28, %s2383_s16  ;;  %p2389_p9 = scmp.lt.s32.totalorder %s2383_s16, %s2383_s16 }
  0x4d   :  { %p2390_p10 = por %p2389_p9, %p2388_p8 }
  0x4f   :  { %p2391_p11 = pnand %p2390_p10, %p2384_p7 }
  0x51   :  { %2394 = shalt.err (!%p2391_p11)
}
  0x52   :  { %76 = dma.hbm_to_vmem [thread:$0]  %s2785_s5, 1024, %s71_s28, [#allocation8], %s2403_s13, %s2403_s13, %s2404_s14  }
  0x53   :  { %2395 = dma.done.wait [#allocation3], 256  }
  0x54   :  { %2396 = vsyncadd [#allocation3], 4294967040 }
  0x55   :  { %2397 = dma.done.wait [#allocation5], 768  }
  0x56   :  { %2398 = vsyncadd [#allocation5], 4294966528 }
  0x57   :  { %2399 = dma.done.wait [#allocation8], 1536  }
  0x58   :  { %2400 = vsyncadd [#allocation8], 4294965760  ;;  %vm114_vm0 = vcmask 261120   ;;  %v103_v0 = vld [vmem:[#allocation6] sm:$0xff]  ;;  %v104_v1 = vld [vmem:[#allocation6 + $0x8] sm:$0xff]  ;;  %v2408_v10 = vmov 0.0  }
  0x59   :  { %v105_v2 = vld [vmem:[#allocation6 + $0x10] sm:$0xff]  ;;  %v2192_v3 = vpack.c.bf16 %v104_v1, %v103_v0  ;;  %v106_v4 = vld [vmem:[#allocation6 + $0x18] sm:$0xff]  ;;  %v2547_v5 = vld [vmem:[#allocation2] sm:$0xff]  ;;  %2079 = vmatprep.subr.mxu1 %v2408_v10  ;;  %s2409_s4 = smov 112   ;;  %s2410_s27 = smov 120   ;;  %vm2411_vm1 = vmmov 0  }
  0x5a   :  { %v2196_v6 = vpack.c.bf16 %v106_v4, %v105_v2  ;;  %2076 = vmatprep.mubr.msk.f32.mxu0 %vm114_vm0, %v2547_v5  ;;  %v2551_v7 = vld [vmem:[#allocation2 + $0x8] sm:$0xff]  ;;  %v1978_v8 = vld [vmem:[%s2783_s3] ss:$0 sm:$0xff]  ;;  %2081 = vmatprep.mubr.msk.f32.mxu1 %vm2411_vm1, %v2408_v10  ;;  %s2412_s3 = smov 104   ;;  %s2413_s17 = smov 96   ;;  %vm212_vm2 = vcmask 64512  }
  0x5b   :  { %2193 = vmatprep.subr.bf16.mxu0 %v2192_v3  ;;  %v97_v28 = vld [vmem:[#allocation4] sm:$0xff]  ;;  %v98_v29 = vld [vmem:[#allocation4 + $0x8] sm:$0xff]  ;;  %s2414_s18 = smov 64   ;;  %s2415_s19 = smov 16   ;;  %vm1541_vm5 = vcmask 130048   ;;  %vm1544_vm6 = vcmask 195584  }
  0x5c   :  { %2195 = vmatpush3.bf16.msra.mxu0 %v2192_v3  ;;  %vm99_vm3 = vcmp.eq.f32.partialorder %v97_v28, 0.0  ;;  %vm100_vm4 = vcmp.eq.f32.partialorder %v98_v29, 0.0  ;;  %s2416_s20 = smov 24   ;;  %vm1909_vm7 = vcmask 1041409   ;;  %vm1952_vm8 = vcmask 523264  }
  0x5d   :  { %2197 = vmatprep.subr.bf16.mxu0 %v2196_v6  ;;  %v101_v30 = vsel %vm99_vm3, -1e+30, %v2408_v10  ;;  %v102_v34 = vsel %vm100_vm4, -1e+30, %v2408_v10  ;;  %vm1954_vm9 = vcmask 785408  }
  0x60   :  { %2199 = vmatpush3.bf16.msra.mxu0 %v2196_v6 }
  0x61   :  { %2099 = vmatprep.subr.mxu0 %v2408_v10 }
  0x63   :  { %2077 = vmatmul.mubr.msk.f32.vlgmr.msra.gmra.mrb[0].mxu0 %vm114_vm0, %v2551_v7 }
  0x64   :  { %2101 = vmatprep.mubr.msk.f32.mxu0 %vm2411_vm1, %v2408_v10 }
 0x136   :  { %v2078_v9 = vpop.f32.mrb[0].mxu0 }
 0x137   :  { %v187_v11 = vpop.f32.mrb[1].mxu0  ;;  %v2568_v13 = vadd.f32 %v2078_v9, %v1978_v8 }
 0x138   :  { %v2560_v12 = vadd.f32 %v1978_v8, %v187_v11 }
 0x13a   :  { %202 = vrot.lane.b32.xlu1 %v2560_v12, %s2409_s4  ;;  %198 = vrot.lane.b32.xlu0 %v2560_v12, %s2410_s27 }
 0x13e   :  { %204 = vrot.lane.b32.xlu1 %v2568_v13, %s2409_s4  ;;  %200 = vrot.lane.b32.xlu0 %v2568_v13, %s2410_s27 }
 0x142   :  { %208 = vrot.lane.b32.xlu1 %v2568_v13, %s2412_s3  ;;  %206 = vrot.lane.b32.xlu0 %v2560_v12, %s2412_s3 }
 0x146   :  { %287 = vrot.lane.b32.xlu1 %v2568_v13, %s2413_s17  ;;  %210 = vrot.lane.b32.xlu0 %v2560_v12, %s2413_s17 }
 0x1ac   :  { %v2578_v14 = vpop.permute.xlu1 %202  ;;  %v2580_v15 = vpop.permute.xlu0 %198 }
 0x1ad   :  { %363 = vrot.lane.b32.xlu0 %v2580_v15, %s2413_s17 }
 0x1b0   :  { %v2584_v16 = vpop.permute.xlu1 %204  ;;  %v2586_v17 = vpop.permute.xlu0 %200 }
 0x1b1   :  { %515 = vrot.lane.b32.xlu0 %v2578_v14, %s2413_s17  ;;  %439 = vrot.lane.b32.xlu1 %v2586_v17, %s2413_s17 }
 0x1b4   :  { %v2592_v18 = vpop.permute.xlu0 %206  ;;  %v2598_v19 = vpop.permute.xlu1 %208 }
 0x1b5   :  { %591 = vrot.lane.b32.xlu1 %v2584_v16, %s2413_s17  ;;  %667 = vrot.lane.b32.xlu0 %v2592_v18, %s2413_s17 }
 0x1b8   :  { %v211_v20 = vpop.permute.xlu0 %210  ;;  %v288_v21 = vpop.permute.xlu1 %287 }
 0x1b9   :  { %743 = vrot.lane.b32.xlu1 %v2598_v19, %s2413_s17  ;;  %2080 = vmatpush3.xpose.msk.msra.mxu1 %vm212_vm2, %v211_v20 }
 0x1ba   :  { %2084 = vmatprep.subr.mxu1 %v2408_v10 }
 0x1bc   :  { %2082 = vmatmul.mubr.msk.f32.vlgmr.msra.gmra.mrb[0].mxu1 %vm212_vm2, %v2560_v12 }
 0x1bd   :  { %2085 = vmatpush3.xpose.msk.msra.mxu1 %vm212_vm2, %v288_v21  ;;  %2086 = vmatprep.mubr.msk.f32.mxu1 %vm2411_vm1, %v2408_v10 }
 0x1be   :  { %2089 = vmatprep.subr.mxu1 %v2408_v10 }
 0x1c0   :  { %2087 = vmatmul.mubr.msk.f32.vlgmr.msra.gmra.mrb[2].mxu1 %vm212_vm2, %v2568_v13 }
 0x1c1   :  { %2091 = vmatprep.mubr.msk.f32.mxu1 %vm2411_vm1, %v2408_v10 }
 0x21f   :  { %v364_v22 = vpop.permute.xlu0 %363 }
 0x220   :  { %2090 = vmatpush3.xpose.msk.msra.mxu1 %vm212_vm2, %v364_v22 }
 0x221   :  { %2094 = vmatprep.subr.mxu1 %v2408_v10 }
 0x223   :  { %v440_v23 = vpop.permute.xlu1 %439  ;;  %2092 = vmatmul.mubr.msk.f32.vlgmr.msra.gmra.mrb[4].mxu1 %vm212_vm2, %v2580_v15  ;;  %v516_v24 = vpop.permute.xlu0 %515 }
 0x224   :  { %2095 = vmatpush3.xpose.msk.msra.mxu1 %vm212_vm2, %v440_v23  ;;  %2100 = vmatpush3.xpose.msk.msra.mxu0 %vm212_vm2, %v516_v24 }
 0x225   :  { %2096 = vmatprep.mubr.msk.f32.mxu1 %vm2411_vm1, %v2408_v10  ;;  %2104 = vmatprep.subr.mxu1 %v2408_v10 }
 0x226   :  { %2109 = vmatprep.subr.mxu0 %v2408_v10 }
 0x227   :  { %v592_v25 = vpop.permute.xlu1 %591  ;;  %2097 = vmatmul.mubr.msk.f32.vlgmr.msra.gmra.mrb[6].mxu1 %vm212_vm2, %v2586_v17  ;;  %2102 = vmatmul.mubr.msk.f32.vlgmr.msra.gmra.mrb[2].mxu0 %vm212_vm2, %v2578_v14  ;;  %v668_v26 = vpop.permute.xlu0 %667 }
 0x228   :  { %2105 = vmatpush3.xpose.msk.msra.mxu1 %vm212_vm2, %v592_v25  ;;  %2110 = vmatpush3.xpose.msk.msra.mxu0 %vm212_vm2, %v668_v26 }
 0x229   :  { %2106 = vmatprep.mubr.msk.f32.mxu1 %vm2411_vm1, %v2408_v10  ;;  %2111 = vmatprep.mubr.msk.f32.mxu0 %vm2411_vm1, %v2408_v10 }
 0x22a   :  { %2114 = vmatprep.subr.mxu1 %v2408_v10  ;;  %2119 = vmatprep.subr.mxu0 %v2408_v10 }
 0x22b   :  { %v744_v27 = vpop.permute.xlu1 %743  ;;  %2107 = vmatmul.mubr.msk.f32.vlgmr.msra.gmra.mrb[8].mxu1 %vm212_vm2, %v2584_v16  ;;  %2112 = vmatmul.mubr.msk.f32.vlgmr.msra.gmra.mrb[4].mxu0 %vm212_vm2, %v2592_v18 }
 0x22c   :  { %2115 = vmatpush3.xpose.msk.msra.mxu1 %vm212_vm2, %v744_v27  ;;  %2116 = vmatprep.mubr.msk.f32.mxu1 %vm2411_vm1, %v2408_v10 }
 0x22d   :  { %2124 = vmatprep.subr.mxu1 %v2408_v10  ;;  %2121 = vmatprep.mubr.msk.f32.mxu0 %vm2411_vm1, %v2408_v10 }
 0x22f   :  { %2117 = vmatmul.mubr.msk.f32.vlgmr.msra.gmra.mrb[10].mxu1 %vm212_vm2, %v2598_v19 }
 0x230   :  { %2126 = vmatprep.mubr.msk.f32.mxu1 %vm2411_vm1, %v2408_v10 }
 0x28f   :  { %v283_v31 = vpop.f32.mrb[0].mxu1 }
 0x290   :  { %v284_v32 = vadd.f32 %v283_v31, %v101_v30  ;;  %v2083_v33 = vpop.f32.mrb[1].mxu1 }
 0x292   :  { %v819_v35 = vsel %vm212_vm2, %v284_v32, -inf }
 0x293   :  { %820 = vmax.xlane.f32.xlu0 %v819_v35  ;;  %v359_v36 = vpop.f32.mrb[2].mxu1 }
 0x294   :  { %v360_v37 = vadd.f32 %v359_v36, %v102_v34  ;;  %v2088_v38 = vpop.f32.mrb[3].mxu1 }
 0x296   :  { %v822_v39 = vsel %vm212_vm2, %v360_v37, -inf }
 0x297   :  { %823 = vmax.xlane.f32.xlu1 %v822_v39 }
 0x2f6   :  { %v435_v40 = vpop.f32.mrb[4].mxu1 }
 0x2f7   :  { %v436_v41 = vadd.f32 %v435_v40, %v101_v30  ;;  %v2093_v42 = vpop.f32.mrb[5].mxu1 }
 0x2f9   :  { %v825_v43 = vsel %vm212_vm2, %v436_v41, -inf }
 0x2fa   :  { %826 = vmax.xlane.f32.xlu0 %v825_v43  ;;  %v511_v44 = vpop.f32.mrb[6].mxu1  ;;  %v587_v45 = vpop.f32.mrb[2].mxu0 }
 0x2fb   :  { %v512_v46 = vadd.f32 %v511_v44, %v102_v34  ;;  %v588_v47 = vadd.f32 %v587_v45, %v101_v30  ;;  %v2098_v48 = vpop.f32.mrb[7].mxu1  ;;  %v2103_v49 = vpop.f32.mrb[3].mxu0 }
 0x2fd   :  { %v828_v50 = vsel %vm212_vm2, %v512_v46, -inf  ;;  %v831_v51 = vsel %vm212_vm2, %v588_v47, -inf }
 0x2fe   :  { %829 = vmax.xlane.f32.xlu0 %v828_v50  ;;  %v663_v52 = vpop.f32.mrb[8].mxu1  ;;  %832 = vmax.xlane.f32.xlu1 %v831_v51  ;;  %v739_v53 = vpop.f32.mrb[4].mxu0 }
 0x2ff   :  { %v664_v54 = vadd.f32 %v663_v52, %v102_v34  ;;  %v740_v55 = vadd.f32 %v739_v53, %v101_v30  ;;  %v2108_v56 = vpop.f32.mrb[9].mxu1  ;;  %v2113_v57 = vpop.f32.mrb[5].mxu0 }
 0x301   :  { %v834_v58 = vsel %vm212_vm2, %v664_v54, -inf  ;;  %v837_v59 = vsel %vm212_vm2, %v740_v55, -inf }
 0x302   :  { %835 = vmax.xlane.f32.xlu0 %v834_v58  ;;  %v815_v60 = vpop.f32.mrb[10].mxu1  ;;  %838 = vmax.xlane.f32.xlu1 %v837_v59 }
 0x303   :  { %v816_v61 = vadd.f32 %v815_v60, %v102_v34  ;;  %v2118_v62 = vpop.f32.mrb[11].mxu1 }
 0x305   :  { %v840_v63 = vsel %vm212_vm2, %v816_v61, -inf }
 0x306   :  { %841 = vmax.xlane.f32.xlu0 %v840_v63 }
 0x313   :  { %907 = vrot.lane.b32.xlu1 %v2560_v12, %s2414_s18 }
 0x317   :  { %1059 = vrot.lane.b32.xlu1 %v2580_v15, %s2414_s18 }
 0x31b   :  { %1135 = vrot.lane.b32.xlu1 %v2586_v17, %s2414_s18 }
 0x31c   :  { %983 = vrot.lane.b32.xlu0 %v2568_v13, %s2414_s18 }
 0x31f   :  { %1287 = vrot.lane.b32.xlu1 %v2584_v16, %s2414_s18 }
 0x320   :  { %1211 = vrot.lane.b32.xlu0 %v2578_v14, %s2414_s18  ;;  %v821_v2 = vpop.xlane.xlu0 %820 }
 0x321   :  { %v843_v3 = vsub.f32 %v284_v32, %v821_v2 }
 0x323   :  { %v851_v6 = vmul.f32 1.442695, %v843_v3 }
 0x324   :  { %v824_v0 = vpop.xlane.xlu1 %823 }
 0x325   :  { %v844_v1 = vsub.f32 %v360_v37, %v824_v0 }
 0x327   :  { %v853_v4 = vmul.f32 1.442695, %v844_v1 }
 0x329   :  { %2241 = vpow2.f32 %v853_v4 }
 0x32a   :  { %2243 = vpow2.f32 %v851_v6 }
 0x333   :  { %v2672_v8 = vpop.eup %2241 }
 0x334   :  { %v870_v9 = vsel %vm212_vm2, %v2672_v8, 0.0  ;;  %v2676_v11 = vpop.eup %2243 }
 0x335   :  { %v867_v12 = vsel %vm212_vm2, %v2676_v11, 0.0 }
 0x33f   :  { %871 = vadd.xlane.f32.xlu0 %v870_v9 }
 0x343   :  { %868 = vadd.xlane.f32.xlu1 %v867_v12 }
 0x387   :  { %v827_v13 = vpop.xlane.xlu0 %826 }
 0x388   :  { %v845_v14 = vsub.f32 %v436_v41, %v827_v13 }
 0x38a   :  { %v855_v15 = vmul.f32 1.442695, %v845_v14 }
 0x38b   :  { %v833_v16 = vpop.xlane.xlu1 %832  ;;  %v830_v17 = vpop.xlane.xlu0 %829 }
 0x38c   :  { %2245 = vpow2.f32 %v855_v15  ;;  %v847_v20 = vsub.f32 %v588_v47, %v833_v16  ;;  %v846_v21 = vsub.f32 %v512_v46, %v830_v17 }
 0x38e   :  { %v859_v22 = vmul.f32 1.442695, %v847_v20  ;;  %v857_v23 = vmul.f32 1.442695, %v846_v21  ;;  %v1547_v20 = vld [vmem:[#allocation7] sm:$0xff]  ;;  %v1548_v21 = vld [vmem:[#allocation7 + $0x8] sm:$0xff] }
 0x38f   :  { %v839_v24 = vpop.xlane.xlu1 %838  ;;  %v836_v25 = vpop.xlane.xlu0 %835 }
 0x390   :  { %2247 = vpow2.f32 %v859_v22  ;;  %v849_v26 = vsub.f32 %v740_v55, %v839_v24  ;;  %v848_v27 = vsub.f32 %v664_v54, %v836_v25  ;;  %v2200_v22 = vpack.c.bf16 %v1548_v21, %v1547_v20  ;;  %v1550_v24 = vld [vmem:[#allocation7 + $0x18] sm:$0xff] }
 0x391   :  { %2249 = vpow2.f32 %v857_v23  ;;  %v1549_v23 = vld [vmem:[#allocation7 + $0x10] sm:$0xff] }
 0x392   :  { %v863_v28 = vmul.f32 1.442695, %v849_v26  ;;  %v861_v29 = vmul.f32 1.442695, %v848_v27  ;;  %v2204_v25 = vpack.c.bf16 %v1550_v24, %v1549_v23 }
 0x393   :  { %v908_v30 = vpop.permute.xlu1 %907  ;;  %v842_v31 = vpop.xlane.xlu0 %841 }
 0x394   :  { %2251 = vpow2.f32 %v863_v28  ;;  %v850_v32 = vsub.f32 %v816_v61, %v842_v31  ;;  %2120 = vmatpush3.msra.mxu0 %v908_v30 }
 0x395   :  { %2253 = vpow2.f32 %v861_v29  ;;  %2129 = vmatprep.subr.mxu0 %v2408_v10 }
 0x396   :  { %v2246_v33 = vpop.eup %2245  ;;  %v865_v34 = vmul.f32 1.442695, %v850_v32 }
 0x397   :  { %v984_v35 = vpop.permute.xlu0 %983  ;;  %v873_v36 = vsel %vm212_vm2, %v2246_v33, 0.0  ;;  %v1060_v47 = vpop.permute.xlu1 %1059 }
 0x398   :  { %2255 = vpow2.f32 %v865_v34  ;;  %874 = vadd.xlane.f32.xlu1 %v873_v36  ;;  %2125 = vmatpush3.msra.mxu1 %v984_v35 }
 0x399   :  { %2134 = vmatprep.subr.mxu1 %v2408_v10 }
 0x39a   :  { %v2248_v37 = vpop.eup %2247 }
 0x39b   :  { %v2250_v38 = vpop.eup %2249  ;;  %v879_v39 = vsel %vm212_vm2, %v2248_v37, 0.0  ;;  %v1136_v48 = vpop.permute.xlu1 %1135 }
 0x39c   :  { %880 = vadd.xlane.f32.xlu1 %v879_v39  ;;  %v876_v40 = vsel %vm212_vm2, %v2250_v38, 0.0  ;;  %v1212_v49 = vpop.permute.xlu0 %1211 }
 0x39d   :  { %877 = vadd.xlane.f32.xlu0 %v876_v40 }
 0x39e   :  { %v2252_v41 = vpop.eup %2251 }
 0x39f   :  { %v2254_v42 = vpop.eup %2253  ;;  %v885_v43 = vsel %vm212_vm2, %v2252_v41, 0.0  ;;  %v1288_v50 = vpop.permute.xlu1 %1287 }
 0x3a0   :  { %886 = vadd.xlane.f32.xlu1 %v885_v43  ;;  %v882_v44 = vsel %vm212_vm2, %v2254_v42, 0.0 }
 0x3a1   :  { %883 = vadd.xlane.f32.xlu0 %v882_v44 }
 0x3a2   :  { %v2687_v45 = vpop.eup %2255 }
 0x3a3   :  { %v888_v46 = vsel %vm212_vm2, %v2687_v45, 0.0 }
 0x3a5   :  { %889 = vadd.xlane.f32.xlu0 %v888_v46 }
 0x3b1   :  { %1439 = vrot.lane.b32.xlu1 %v2598_v19, %s2414_s18 }
 0x3bb   :  { %1363 = vrot.lane.b32.xlu0 %v2592_v18, %s2414_s18 }
 0x3cc   :  { %v872_v51 = vpop.xlane.xlu0 %871 }
 0x3cd   :  { %2257 = vrcp.f32 %v872_v51 }
 0x3d0   :  { %v869_v52 = vpop.xlane.xlu1 %868 }
 0x3d1   :  { %2259 = vrcp.f32 %v869_v52  ;;  %v2734_v52 = vld [vmem:[%s2786_s6] sm:$0x7f]  ;;  %s2417_s6 = smov 32  }
 0x3d7   :  { %v2258_v53 = vpop.eup %2257 }
 0x3d8   :  { %v900_v54 = vmul.f32 %v2258_v53, %v2672_v8 }
 0x3da   :  { %2127 = vmatmul.mubr.msk.f32.vlgmr.msra.gmra.mrb[12].mxu1 %vm212_vm2, %v900_v54 }
 0x3db   :  { %v2260_v55 = vpop.eup %2259  ;;  %2135 = vmatpush3.msra.mxu1 %v1136_v48  ;;  %2136 = vmatprep.mubr.msk.f32.mxu1 %vm2411_vm1, %v2408_v10 }
 0x3dc   :  { %v899_v18 = vmul.f32 %v2260_v55, %v2676_v11  ;;  %2144 = vmatprep.subr.mxu1 %v2408_v10 }
 0x3de   :  { %2122 = vmatmul.mubr.msk.f32.vlgmr.msra.gmra.mrb[6].mxu0 %vm212_vm2, %v899_v18 }
 0x3df   :  { %2130 = vmatpush3.msra.mxu0 %v1060_v47  ;;  %2131 = vmatprep.mubr.msk.f32.mxu0 %vm2411_vm1, %v2408_v10 }
 0x3e0   :  { %2139 = vmatprep.subr.mxu0 %v2408_v10 }
 0x425   :  { %v875_v19 = vpop.xlane.xlu1 %874 }
 0x426   :  { %2261 = vrcp.f32 %v875_v19 }
 0x429   :  { %v881_v56 = vpop.xlane.xlu1 %880 }
 0x42a   :  { %2263 = vrcp.f32 %v881_v56  ;;  %v878_v57 = vpop.xlane.xlu0 %877 }
 0x42b   :  { %2265 = vrcp.f32 %v878_v57 }
 0x42d   :  { %v887_v58 = vpop.xlane.xlu1 %886 }
 0x42e   :  { %2267 = vrcp.f32 %v887_v58  ;;  %v884_v59 = vpop.xlane.xlu0 %883 }
 0x42f   :  { %2269 = vrcp.f32 %v884_v59 }
 0x430   :  { %v2262_v60 = vpop.eup %2261 }
 0x431   :  { %v901_v61 = vmul.f32 %v2262_v60, %v2246_v33  ;;  %v1440_v11 = vpop.permute.xlu1 %1439 }
 0x432   :  { %v890_v62 = vpop.xlane.xlu0 %889 }
 0x433   :  { %2271 = vrcp.f32 %v890_v62  ;;  %2132 = vmatmul.mubr.msk.f32.vlgmr.msra.gmra.mrb[8].mxu0 %vm212_vm2, %v901_v61 }
 0x434   :  { %v2264_v63 = vpop.eup %2263  ;;  %2140 = vmatpush3.msra.mxu0 %v1212_v49  ;;  %2141 = vmatprep.mubr.msk.f32.mxu0 %vm2411_vm1, %v2408_v10  ;;  %v1551_v49 = vlaneseq }
 0x435   :  { %v2266_v0 = vpop.eup %2265  ;;  %v903_v1 = vmul.f32 %v2264_v63, %v2248_v37  ;;  %2149 = vmatprep.subr.mxu0 %v2408_v10 }
 0x436   :  { %v902_v2 = vmul.f32 %v2266_v0, %v2250_v38  ;;  %v1364_v3 = vpop.permute.xlu0 %1363 }
 0x437   :  { %2142 = vmatmul.mubr.msk.f32.vlgmr.msra.gmra.mrb[10].mxu0 %vm212_vm2, %v903_v1 }
 0x438   :  { %v2268_v4 = vpop.eup %2267  ;;  %2137 = vmatmul.mubr.msk.f32.vlgmr.msra.gmra.mrb[14].mxu1 %vm212_vm2, %v902_v2  ;;  %2150 = vmatpush3.msra.mxu0 %v1364_v3 }
 0x439   :  { %v2270_v6 = vpop.eup %2269  ;;  %v905_v8 = vmul.f32 %v2268_v4, %v2252_v41  ;;  %2145 = vmatpush3.msra.mxu1 %v1288_v50  ;;  %2146 = vmatprep.mubr.msk.f32.mxu1 %vm2411_vm1, %v2408_v10  ;;  %v2728_v50 = vshrl.u32 %v1551_v49, 7 }
 0x43a   :  { %v904_v9 = vmul.f32 %v2270_v6, %v2254_v42  ;;  %2151 = vmatprep.mubr.msk.f32.mxu0 %vm2411_vm1, %v2408_v10  ;;  %2154 = vmatprep.subr.mxu1 %v2408_v10  ;;  %v1678_v6 = vld [vmem:[#allocation9 + $0x8] sm:$0xff] }
 0x43b   :  { %2152 = vmatmul.mubr.msk.f32.vlgmr.msra.gmra.mrb[12].mxu0 %vm212_vm2, %v905_v8  ;;  %2201 = vmatprep.subr.bf16.mxu0 %v2200_v22  ;;  %v1553_v51 = vsub.s32 0, %v2728_v50  ;;  %v1667_v21 = vsub.s32 1, %v2728_v50 }
 0x43c   :  { %2147 = vmatmul.mubr.msk.f32.vlgmr.msra.gmra.mrb[16].mxu1 %vm212_vm2, %v904_v9  ;;  %2203 = vmatpush3.bf16.msra.mxu0 %v2200_v22  ;;  %v1679_v9 = vld [vmem:[#allocation9 + $0x10] sm:$0xff]  ;;  %v1673_v22 = vsub.s32 2, %v2728_v50 }
 0x43d   :  { %v2272_v12 = vpop.eup %2271  ;;  %2155 = vmatpush3.msra.mxu1 %v1440_v11  ;;  %2156 = vmatprep.mubr.msk.f32.mxu1 %vm2411_vm1, %v2408_v10  ;;  %v1554_v53 = vrot.slane %v2734_v52, %v1553_v51  ;;  %v1680_v11 = vld [vmem:[#allocation9 + $0x18] sm:$0xff]  ;;  %v1668_v23 = vrot.slane %v2734_v52, %v1667_v21 }
 0x43e   :  { %v906_v13 = vmul.f32 %v2272_v12, %v2687_v45  ;;  %2205 = vmatprep.subr.bf16.mxu0 %v2204_v25  ;;  %v2212_v12 = vpack.c.bf16 %v1680_v11, %v1679_v9 }
 0x440   :  { %2157 = vmatmul.mubr.msk.f32.vlgmr.msra.gmra.mrb[18].mxu1 %vm212_vm2, %v906_v13  ;;  %2207 = vmatpush3.bf16.msra.mxu0 %v2204_v25 }
 0x4ad   :  { %v1055_v14 = vpop.f32.mrb[12].mxu1 }
 0x4ae   :  { %v2128_v15 = vpop.f32.mrb[13].mxu1 }
 0x4b1   :  { %v979_v16 = vpop.f32.mrb[6].mxu0 }
 0x4b2   :  { %v2123_v17 = vpop.f32.mrb[7].mxu0 }
 0x506   :  { %v1131_v26 = vpop.f32.mrb[8].mxu0 }
 0x507   :  { %v2133_v10 = vpop.f32.mrb[9].mxu0  ;;  %1517 = vrot.lane.b32.xlu0 %v1131_v26, %s2404_s14  ;;  %v1674_v26 = vrot.slane %v2734_v52, %v1673_v22 }
 0x50a   :  { %v1283_v27 = vpop.f32.mrb[10].mxu0 }
 0x50b   :  { %v1207_v28 = vpop.f32.mrb[14].mxu1  ;;  %1525 = vrot.lane.b32.xlu0 %v1283_v27, %s2415_s19  ;;  %v2143_v29 = vpop.f32.mrb[11].mxu0 }
 0x50c   :  { %1519 = vrot.lane.b32.xlu1 %v1207_v28, %s2404_s14  ;;  %v2138_v30 = vpop.f32.mrb[15].mxu1 }
 0x50e   :  { %v1435_v31 = vpop.f32.mrb[12].mxu0 }
 0x50f   :  { %v1359_v32 = vpop.f32.mrb[16].mxu1  ;;  %1533 = vrot.lane.b32.xlu0 %v1435_v31, %s2416_s20  ;;  %v2153_v33 = vpop.f32.mrb[13].mxu0 }
 0x510   :  { %1527 = vrot.lane.b32.xlu1 %v1359_v32, %s2415_s19  ;;  %v2148_v34 = vpop.f32.mrb[17].mxu1  ;;  %v1777_v32 = vld [vmem:[#allocation9 + $0x20] sm:$0xff]  ;;  %v1778_v33 = vld [vmem:[#allocation9 + $0x28] sm:$0xff] }
 0x511   :  { %v2216_v34 = vpack.c.bf16 %v1778_v33, %v1777_v32 }
 0x513   :  { %v1511_v35 = vpop.f32.mrb[18].mxu1  ;;  %2217 = vmatprep.subr.bf16.mxu0 %v2216_v34 }
 0x514   :  { %1535 = vrot.lane.b32.xlu1 %v1511_v35, %s2416_s20  ;;  %v2158_v36 = vpop.f32.mrb[19].mxu1  ;;  %v1779_v35 = vld [vmem:[#allocation9 + $0x30] sm:$0xff] }
 0x515   :  { %v1780_v36 = vld [vmem:[#allocation9 + $0x38] sm:$0xff] }
 0x579   :  { %v1518_v37 = vpop.permute.xlu0 %1517 }
 0x57a   :  { %v1539_v40 = vsel %vm212_vm2, %v979_v16, %v1518_v37  ;;  %v2220_v37 = vpack.c.bf16 %v1780_v36, %v1779_v35 }
 0x57d   :  { %v1526_v38 = vpop.permute.xlu0 %1525 }
 0x57e   :  { %v1520_v39 = vpop.permute.xlu1 %1519  ;;  %v1542_v41 = vsel %vm1541_vm5, %v1539_v40, %v1526_v38  ;;  %v1683_v38 = vsub.s32 3, %v2728_v50 }
 0x57f   :  { %v1540_v45 = vsel %vm212_vm2, %v1055_v14, %v1520_v39 }
 0x580   :  { %v1684_v39 = vrot.slane %v2734_v52, %v1683_v38 }
 0x581   :  { %v1534_v42 = vpop.permute.xlu0 %1533 }
 0x582   :  { %v1528_v43 = vpop.permute.xlu1 %1527  ;;  %v1545_v44 = vsel %vm1544_vm6, %v1542_v41, %v1534_v42 }
 0x583   :  { %2167 = vmatprep.mubr.msk.f32.mxu0 %vm114_vm0, %v1545_v44  ;;  %v1543_v46 = vsel %vm1541_vm5, %v1540_v45, %v1528_v43 }
 0x586   :  { %v1536_v47 = vpop.permute.xlu1 %1535 }
 0x587   :  { %v1546_v48 = vsel %vm1544_vm6, %v1543_v46, %v1536_v47 }
 0x588   :  { %2168 = vmatmul.mubr.msk.f32.vlgmr.msra.gmra.mrb[14].mxu0 %vm114_vm0, %v1546_v48 }
 0x589   :  { %2219 = vmatpush3.bf16.msra.mxu0 %v2216_v34 }
 0x58a   :  { %2221 = vmatprep.subr.bf16.mxu0 %v2220_v37 }
 0x58d   :  { %2223 = vmatpush3.bf16.msra.mxu0 %v2220_v37 }
 0x65b   :  { %v2169_v54 = vpop.f32.mrb[14].mxu0 }
 0x65c   :  { %v1633_v55 = vadd.f32 %v2169_v54, %v1554_v53  ;;  %v1627_v18 = vpop.f32.mrb[15].mxu0 }
 0x65d   :  { %v1628_v19 = vadd.f32 %v1627_v18, %v1554_v53  ;;  %v1783_v18 = vsub.s32 4, %v2728_v50 }
 0x65e   :  { %v1637_v56 = vadd.f32 %v1633_v55, %v2551_v7 }
 0x65f   :  { %v1636_v57 = vadd.f32 %v1628_v19, %v2547_v5  ;;  %v1677_v5 = vld [vmem:[#allocation9] sm:$0xff]  ;;  %v1784_v19 = vrot.slane %v2734_v52, %v1783_v18 }
 0x660   :  { %v1641_v58 = vsel %vm114_vm0, %v1637_v56, 0.0  ;;  %v2208_v8 = vpack.c.bf16 %v1678_v6, %v1677_v5 }
 0x661   :  { %1642 = vadd.xlane.f32.xlu1 %v1641_v58  ;;  %v1638_v59 = vsel %vm114_vm0, %v1636_v57, 0.0 }
 0x662   :  { %1639 = vadd.xlane.f32.xlu0 %v1638_v59  ;;  %2209 = vmatprep.subr.bf16.mxu1 %v2208_v8 }
 0x663   :  { %2211 = vmatpush3.bf16.msra.mxu1 %v2208_v8 }
 0x664   :  { %2213 = vmatprep.subr.bf16.mxu1 %v2212_v12 }
 0x667   :  { %2215 = vmatpush3.bf16.msra.mxu1 %v2212_v12 }
 0x6ee   :  { %v1643_v60 = vpop.xlane.xlu1 %1642 }
 0x6ef   :  { %v1646_v61 = vmul.f32 0.03125, %v1643_v60  ;;  %v1640_v62 = vpop.xlane.xlu0 %1639 }
 0x6f0   :  { %v1645_v63 = vmul.f32 0.03125, %v1640_v62 }
 0x6f1   :  { %v1648_v0 = vsub.f32 %v1637_v56, %v1646_v61 }
 0x6f2   :  { %v1647_v1 = vsub.f32 %v1636_v57, %v1645_v63 }
 0x6f3   :  { %v1650_v4 = vmul.f32 %v1648_v0, %v1648_v0 }
 0x6f4   :  { %v1649_v2 = vmul.f32 %v1647_v1, %v1647_v1 }
 0x6f5   :  { %v1654_v7 = vsel %vm114_vm0, %v1650_v4, 0.0 }
 0x6f6   :  { %v1651_v3 = vsel %vm114_vm0, %v1649_v2, 0.0 }
 0x6f7   :  { %1652 = vadd.xlane.f32.xlu0 %v1651_v3 }
 0x6fb   :  { %1655 = vadd.xlane.f32.xlu0 %v1654_v7 }
 0x784   :  { %v1653_v13 = vpop.xlane.xlu0 %1652 }
 0x785   :  { %v1657_v14 = vmul.f32 0.03125, %v1653_v13 }
 0x787   :  { %v1659_v15 = vadd.f32 1e-05, %v1657_v14 }
 0x788   :  { %v1656_v16 = vpop.xlane.xlu0 %1655 }
 0x789   :  { %2273 = vrsqrt.f32 %v1659_v15  ;;  %v1658_v17 = vmul.f32 0.03125, %v1656_v16 }
 0x78b   :  { %v1660_v20 = vadd.f32 1e-05, %v1658_v17  ;;  %v1896_v17 = vsub.s32 5, %v2728_v50 }
 0x78d   :  { %2275 = vrsqrt.f32 %v1660_v20  ;;  %v1902_v20 = vsub.s32 6, %v2728_v50  ;;  %v1897_v21 = vrot.slane %v2734_v52, %v1896_v17 }
 0x793   :  { %v2274_v24 = vpop.eup %2273 }
 0x794   :  { %v1663_v25 = vmul.f32 %v2274_v24, %v1647_v1  ;;  %v1903_v24 = vrot.slane %v2734_v52, %v1902_v20 }
 0x796   :  { %v1669_v10 = vmul.f32 %v1668_v23, %v1663_v25 }
 0x797   :  { %v2276_v27 = vpop.eup %2275 }
 0x798   :  { %v1664_v28 = vmul.f32 %v2276_v27, %v1648_v0  ;;  %v1675_v29 = vadd.f32 %v1674_v26, %v1669_v10 }
 0x79a   :  { %v1670_v30 = vmul.f32 %v1668_v23, %v1664_v28  ;;  %2178 = vmatprep.mubr.msk.f32.mxu1 %vm114_vm0, %v1675_v29 }
 0x79c   :  { %v1676_v31 = vadd.f32 %v1674_v26, %v1670_v30 }
 0x79e   :  { %2179 = vmatmul.mubr.msk.f32.vlgmr.msra.gmra.mrb[20].mxu1 %vm114_vm0, %v1676_v31 }
 0x871   :  { %v2180_v40 = vpop.f32.mrb[20].mxu1 }
 0x872   :  { %v1763_v41 = vadd.f32 %v2180_v40, %v1684_v39  ;;  %v1757_v42 = vpop.f32.mrb[21].mxu1 }
 0x873   :  { %v1758_v43 = vadd.f32 %v1757_v42, %v1684_v39 }
 0x874   :  { %v1769_v44 = vmul.f32 0.70710677, %v1763_v41  ;;  %v1767_v53 = vmul.f32 0.5, %v1763_v41 }
 0x875   :  { %v1768_v45 = vmul.f32 0.70710677, %v1758_v43  ;;  %v1766_v49 = vmul.f32 0.5, %v1758_v43 }
 0x876   :  { %2277 = verf.f32 %v1769_v44 }
 0x877   :  { %2279 = verf.f32 %v1768_v45 }
 0x880   :  { %v2278_v46 = vpop.eup %2277 }
 0x881   :  { %v2280_v47 = vpop.eup %2279  ;;  %v1773_v48 = vadd.f32 1.0, %v2278_v46 }
 0x882   :  { %v1772_v51 = vadd.f32 1.0, %v2280_v47 }
 0x883   :  { %v1775_v55 = vmul.f32 %v1773_v48, %v1767_v53 }
 0x884   :  { %v1774_v54 = vmul.f32 %v1772_v51, %v1766_v49 }
 0x886   :  { %2189 = vmatprep.mubr.msk.f32.mxu0 %vm114_vm0, %v1774_v54 }
 0x887   :  { %2190 = vmatmul.mubr.msk.f32.vlgmr.msra.gmra.mrb[16].mxu0 %vm114_vm0, %v1775_v55 }
 0x95a   :  { %v2191_v56 = vpop.f32.mrb[16].mxu0 }
 0x95b   :  { %v1863_v57 = vadd.f32 %v2191_v56, %v1784_v19  ;;  %v1857_v58 = vpop.f32.mrb[17].mxu0 }
 0x95c   :  { %v1858_v59 = vadd.f32 %v1857_v58, %v1784_v19 }
 0x95d   :  { %v1867_v60 = vadd.f32 %v1863_v57, %v1676_v31 }
 0x95e   :  { %v1866_v61 = vadd.f32 %v1858_v59, %v1675_v29 }
 0x95f   :  { %v1871_v62 = vsel %vm114_vm0, %v1867_v60, 0.0 }
 0x960   :  { %1872 = vadd.xlane.f32.xlu0 %v1871_v62  ;;  %v1868_v63 = vsel %vm114_vm0, %v1866_v61, 0.0 }
 0x961   :  { %1869 = vadd.xlane.f32.xlu1 %v1868_v63 }
 0x9ed   :  { %v1873_v0 = vpop.xlane.xlu0 %1872 }
 0x9ee   :  { %v1875_v1 = vmul.f32 0.03125, %v1873_v0  ;;  %v1870_v2 = vpop.xlane.xlu1 %1869 }
 0x9ef   :  { %v1874_v3 = vmul.f32 0.03125, %v1870_v2 }
 0x9f0   :  { %v1877_v4 = vsub.f32 %v1867_v60, %v1875_v1 }
 0x9f1   :  { %v1876_v7 = vsub.f32 %v1866_v61, %v1874_v3 }
 0x9f2   :  { %v1879_v5 = vmul.f32 %v1877_v4, %v1877_v4 }
 0x9f3   :  { %v1878_v6 = vmul.f32 %v1876_v7, %v1876_v7 }
 0x9f4   :  { %v1883_v8 = vsel %vm114_vm0, %v1879_v5, 0.0 }
 0x9f5   :  { %1884 = vadd.xlane.f32.xlu0 %v1883_v8  ;;  %v1880_v9 = vsel %vm114_vm0, %v1878_v6, 0.0 }
 0x9f6   :  { %1881 = vadd.xlane.f32.xlu1 %v1880_v9 }
 0xa82   :  { %v1885_v11 = vpop.xlane.xlu0 %1884 }
 0xa83   :  { %v1887_v12 = vmul.f32 0.03125, %v1885_v11  ;;  %v1882_v13 = vpop.xlane.xlu1 %1881 }
 0xa84   :  { %v1886_v14 = vmul.f32 0.03125, %v1882_v13 }
 0xa85   :  { %v1889_v15 = vadd.f32 1e-05, %v1887_v12 }
 0xa86   :  { %v1888_v16 = vadd.f32 1e-05, %v1886_v14 }
 0xa87   :  { %2281 = vrsqrt.f32 %v1889_v15 }
 0xa88   :  { %2283 = vrsqrt.f32 %v1888_v16 }
 0xa91   :  { %v2282_v22 = vpop.eup %2281 }
 0xa92   :  { %v2284_v23 = vpop.eup %2283  ;;  %v1893_v25 = vmul.f32 %v2282_v22, %v1877_v4 }
 0xa93   :  { %v1892_v26 = vmul.f32 %v2284_v23, %v1876_v7 }
 0xa94   :  { %v1899_v10 = vmul.f32 %v1897_v21, %v1893_v25 }
 0xa95   :  { %v1898_v27 = vmul.f32 %v1897_v21, %v1892_v26 }
 0xa96   :  { %v1905_v28 = vadd.f32 %v1903_v24, %v1899_v10 }
 0xa97   :  { %v1904_v29 = vadd.f32 %v1903_v24, %v1898_v27 }
 0xa98   :  { %v1934_v30 = vrot.slane %v1905_v28, 4  ;;  %v1924_v33 = vrot.slane %v1905_v28, 2  ;;  %v1918_v34 = vrot.slane %v1905_v28, 1  ;;  %v1930_v35 = vrot.slane %v1905_v28, 3 }
 0xa99   :  { %v1933_v31 = vrot.slane %v1904_v29, 5  ;;  %v1912_v32 = vrot.slane %v1904_v29, 1  ;;  %v1923_v37 = vrot.slane %v1904_v29, 3  ;;  %v1917_v38 = vrot.slane %v1904_v29, 2 }
 0xa9a   :  { %v1929_v52 = vrot.slane %v1904_v29, 4  ;;  %v1908_v39 = vrot.slane %v1905_v28, 7  ;;  %v1939_v44 = vrot.slane %v1904_v29, 6  ;;  %v1940_v45 = vrot.slane %v1905_v28, 5 }
 0xa9b   :  { %v1935_v50 = vsel %vm1909_vm7, %v1934_v30, %v1933_v31  ;;  %v1913_v36 = vsel %vm1909_vm7, %v1905_v28, %v1912_v32  ;;  %v1925_v42 = vsel %vm1909_vm7, %v1924_v33, %v1923_v37  ;;  %v1919_v43 = vsel %vm1909_vm7, %v1918_v34, %v1917_v38 }
 0xa9c   :  { %1936 = vrot.lane.b32.xlu0 %v1935_v50, %s2417_s6  ;;  %1914 = vrot.lane.b32.xlu1 %v1913_v36, %s2417_s6  ;;  %v1931_v40 = vsel %vm1909_vm7, %v1930_v35, %v1929_v52  ;;  %v1910_v41 = vsel %vm1909_vm7, %v1908_v39, %v1904_v29  ;;  %v1941_v46 = vsel %vm1909_vm7, %v1940_v45, %v1939_v44  ;;  %v1945_v47 = vrot.slane %v1904_v29, 7 }
 0xa9d   :  { %v1946_v48 = vrot.slane %v1905_v28, 6 }
 0xa9f   :  { %v1947_v49 = vsel %vm1909_vm7, %v1946_v48, %v1945_v47 }
 0xaa0   :  { %1926 = vrot.lane.b32.xlu0 %v1925_v42, %s2413_s17  ;;  %1920 = vrot.lane.b32.xlu1 %v1919_v43, %s2414_s18 }
 0xaa4   :  { %1942 = vrot.lane.b32.xlu1 %v1941_v46, %s2414_s18 }
 0xaa8   :  { %1948 = vrot.lane.b32.xlu1 %v1947_v49, %s2413_s17 }
 0xb0e   :  { %v1915_v51 = vpop.permute.xlu1 %1914  ;;  %v1937_v53 = vpop.permute.xlu0 %1936 }
 0xb0f   :  { %v1951_v18 = vsel %vm114_vm0, %v1910_v41, %v1915_v51  ;;  %v1956_v57 = vsel %vm114_vm0, %v1931_v40, %v1937_v53 }
 0xb12   :  { %v1921_v54 = vpop.permute.xlu1 %1920  ;;  %v1927_v19 = vpop.permute.xlu0 %1926 }
 0xb13   :  { %v1953_v56 = vsel %vm1952_vm8, %v1951_v18, %v1921_v54 }
 0xb14   :  { %v1955_v60 = vsel %vm1954_vm9, %v1953_v56, %v1927_v19 }
 0xb16   :  { %v1943_v55 = vpop.permute.xlu1 %1942 }
 0xb17   :  { %v1957_v58 = vsel %vm1952_vm8, %v1956_v57, %v1943_v55 }
 0xb1a   :  { %v1949_v59 = vpop.permute.xlu1 %1948 }
 0xb1b   :  { %v1958_v61 = vsel %vm1954_vm9, %v1957_v58, %v1949_v59 }
 0xb1c   :  { %v1961_v62 = vcombine.low %v1955_v60, %v1958_v61 }
 0xb1e   :  { %2011 = vst.sshfl [vmem:[%s2787_s7] sm:$0x33 pattern:$0x76325410] %v1961_v62 }
 0xb1f   :  { %1975 = vsyncpa [#allocation3], 1 }
 0xb20   :  { %1976 = vsyncpa [#allocation5], 1 }
 0xb21   :  { %1977 = vsyncpa [#allocation8], 1 }

</bundles_post_ra>
